<compile_context>
chip_gen: v6e
topology: v6e:2x2x1
jax: 0.10.0
libtpu: 0.0.40
codegen_flags: <defaults>
</compile_context>

<pallas_src>
import functools

import numpy as np

import jax
import jax.numpy as jnp
from jax import lax
from jax.experimental import pallas as pl
from jax.experimental.pallas import tpu as pltpu


# ----------------------------------------------------------------------------
# Chip-aware tuning helpers
# ----------------------------------------------------------------------------
class _ChipInfo:
    def __init__(self, kind, vmem_phys, multi_core, small_mxu):
        self.kind = kind
        self.vmem_phys = vmem_phys
        self.multi_core = multi_core          # 2 TensorCores behind one device
        self.small_mxu = small_mxu            # 4x128^2 MXU generation
        self.min_grid_steps = 4 if multi_core else 1


@functools.lru_cache(maxsize=1)
def _chip_info():
    kind = ""
    try:
        kind = jax.devices()[0].device_kind.lower()
    except Exception:
        pass
    is_v7 = any(t in kind for t in ("v7", "7x", "tpu7"))
    vmem_phys = None
    try:
        vmem_phys = int(pltpu.get_tpu_info().vmem_capacity_bytes)
    except Exception:
        vmem_phys = None
    if vmem_phys is None:
        vmem_phys = (64 << 20) if is_v7 else (128 << 20)
    multi_core = is_v7 or any(t in kind for t in ("v4", "v5p"))
    small_mxu = any(t in kind for t in ("v2", "v3", "v5 lite", "v5lite", "v5e"))
    return _ChipInfo(kind, vmem_phys, multi_core, small_mxu)


def _vmem_limit(bytes_needed, info):
    # Headroom below physical VMEM: ~40 MiB on 64-MiB chips (v7x), up to
    # 96 MiB on 128-MiB chips (v5e/v6e).
    cap = (40 << 20) if info.vmem_phys <= (64 << 20) else (96 << 20)
    return int(min(max(4 * bytes_needed, 8 << 20), cap))


def _round_up(x, m):
    return (x + m - 1) // m * m


def _pick_tile(dim, cands):
    """Pick the candidate tile that minimizes padded size (ties -> larger tile)."""
    best = None
    for t in cands:
        padded = _round_up(dim, t)
        if best is None or padded < best[0] or (padded == best[0] and t > best[1]):
            best = (padded, t)
    return best[1]


def _choose_group_block(num_groups, tokens_per_group, *, min_steps=1, max_rows=256):
    """Largest divisor G_BLK of num_groups with G_BLK*T a multiple of 128 and
    <= max_rows, preferring at least `min_steps` grid steps (falls back by
    halving the step target; single-TC chips pass min_steps=1 = fewest steps)."""
    cands = [g for g in range(1, num_groups + 1)
             if num_groups % g == 0
             and (g * tokens_per_group) % 128 == 0
             and g * tokens_per_group <= max_rows]
    if not cands:
        return None
    target = max(1, int(min_steps))
    while target > 1:
        ok = [g for g in cands if num_groups // g >= target]
        if ok:
            return max(ok)
        target //= 2
    return max(cands)


# ----------------------------------------------------------------------------
# Pallas kernels — linear layers
# ----------------------------------------------------------------------------
def _matmul_kernel(x_ref, w_ref, o_ref):
    o_ref[...] = jnp.dot(
        x_ref[...], w_ref[...], preferred_element_type=jnp.float32
    ).astype(o_ref.dtype)


def _matmul_bias_kernel(x_ref, w_ref, b_ref, o_ref):
    acc = jnp.dot(x_ref[...], w_ref[...], preferred_element_type=jnp.float32)
    o_ref[...] = (acc + b_ref[...]).astype(o_ref.dtype)


def _matmul_tiled_kernel(x_ref, w_ref, o_ref, acc_ref):
    @pl.when(pl.program_id(2) == 0)
    def _():
        acc_ref[...] = jnp.zeros_like(acc_ref)

    acc_ref[...] += jnp.dot(x_ref[...], w_ref[...],
                            preferred_element_type=jnp.float32)

    @pl.when(pl.program_id(2) == pl.num_programs(2) - 1)
    def _():
        o_ref[...] = acc_ref[...].astype(o_ref.dtype)


def _matmul_tiled_bias_kernel(x_ref, w_ref, b_ref, o_ref, acc_ref):
    @pl.when(pl.program_id(2) == 0)
    def _():
        acc_ref[...] = jnp.zeros_like(acc_ref)

    acc_ref[...] += jnp.dot(x_ref[...], w_ref[...],
                            preferred_element_type=jnp.float32)

    @pl.when(pl.program_id(2) == pl.num_programs(2) - 1)
    def _():
        o_ref[...] = (acc_ref[...] + b_ref[...]).astype(o_ref.dtype)


def pallas_linear(x, w, b=None):
    """x: (M, K) @ w: (K, N) [+ b: (N,)] -> (M, N)."""
    M, K = x.shape
    Kw, N = w.shape
    assert K == Kw
    info = _chip_info()
    out_shape = jax.ShapeDtypeStruct((M, N), x.dtype)
    total_bytes = x.nbytes + w.nbytes + M * N * x.dtype.itemsize

    if total_bytes <= (1 << 20):
        # Truly tiny problems: single-step whole-array MXU call.
        if b is None:
            return pl.pallas_call(_matmul_kernel, out_shape=out_shape)(x, w)
        return pl.pallas_call(_matmul_bias_kernel, out_shape=out_shape)(
            x, w, b.reshape(1, N))

    # Tiled streaming path; ragged dims are zero-padded up to tile multiples so
    # we never fall back to a whole-array VMEM load.
    mn_cands = (128,) if info.small_mxu else (256, 128)
    k_cands = (256, 128) if info.small_mxu else (512, 256, 128)
    tm = _pick_tile(M, mn_cands)
    tn = _pick_tile(N, mn_cands)
    tk = _pick_tile(K, k_cands)
    Mp, Np, Kp = _round_up(M, tm), _round_up(N, tn), _round_up(K, tk)

    xp = x if (Mp == M and Kp == K) else jnp.pad(x, ((0, Mp - M), (0, Kp - K)))
    wp = w if (Kp == K and Np == N) else jnp.pad(w, ((0, Kp - K), (0, Np - N)))

    grid = (Mp // tm, Np // tn, Kp // tk)
    x_spec = pl.BlockSpec((tm, tk), lambda i, j, k: (i, k))
    w_spec = pl.BlockSpec((tk, tn), lambda i, j, k: (k, j))
    o_spec = pl.BlockSpec((tm, tn), lambda i, j, k: (i, j))
    need = 2 * (tm * tk + tk * tn + tm * tn) * x.dtype.itemsize + tm * tn * 4
    params = pltpu.CompilerParams(
        dimension_semantics=("parallel", "parallel", "arbitrary"),
        vmem_limit_bytes=_vmem_limit(need, info))
    scratch = [pltpu.VMEM((tm, tn), jnp.float32)]
    padded_out = jax.ShapeDtypeStruct((Mp, Np), x.dtype)

    if b is None:
        out = pl.pallas_call(
            _matmul_tiled_kernel, out_shape=padded_out, grid=grid,
            in_specs=[x_spec, w_spec], out_specs=o_spec,
            scratch_shapes=scratch, compiler_params=params)(xp, wp)
    else:
        bp = b if Np == N else jnp.pad(b, (0, Np - N))
        b_spec = pl.BlockSpec((1, tn), lambda i, j, k: (0, j))
        out = pl.pallas_call(
            _matmul_tiled_bias_kernel, out_shape=padded_out, grid=grid,
            in_specs=[x_spec, w_spec, b_spec], out_specs=o_spec,
            scratch_shapes=scratch, compiler_params=params)(xp, wp,
                                                            bp.reshape(1, Np))
    if Mp != M or Np != N:
        out = out[:M, :N]
    return out


# ----------------------------------------------------------------------------
# Pallas kernel — batched diagonal-block attention
# ----------------------------------------------------------------------------
def _diag_block_attn_kernel(q_ref, kT_ref, v_ref, o_ref, *, scale,
                            tokens_per_block):
    # q/v : (rows, d)  = G_BLK diagonal blocks stacked along the sublane axis.
    # kT  : (d, rows)  = pre-transposed K (lane-dense, no in-kernel transpose).
    q = q_ref[...] * scale             # fold scale into q (rows*d, not rows^2)
    kT = kT_ref[...]
    v = v_ref[...]

    # One MXU matmul covers every block in this step; f32 accumulation.
    s = jnp.dot(q, kT, preferred_element_type=jnp.float32)      # (rows, rows)
    rows = s.shape[0]
    rblk = lax.broadcasted_iota(jnp.int32, (rows, rows), 0) // tokens_per_block
    cblk = lax.broadcasted_iota(jnp.int32, (rows, rows), 1) // tokens_per_block
    s = jnp.where(rblk == cblk, s, jnp.float32(-1e30))          # block-diag mask
    s = s - jnp.max(s, axis=-1, keepdims=True)
    p = jnp.exp(s)
    p = p * pl.reciprocal(jnp.sum(p, axis=-1, keepdims=True), approx=True)

    o_ref[...] = jnp.dot(p.astype(v.dtype), v,
                         preferred_element_type=jnp.float32).astype(o_ref.dtype)


def pallas_block_attention(q, kT, v, scale):
    """q, v: (G, T, d); kT: (d, G*T) — independent softmax inside each block."""
    G, T, d = q.shape
    rows_total = G * T
    qf = q.reshape(rows_total, d)
    vf = v.reshape(rows_total, d)
    info = _chip_info()

    g_blk = _choose_group_block(G, T, min_steps=info.min_grid_steps)
    if g_blk is None:
        g_blk = G                      # single full-array step (always legal)
    rows = g_blk * T
    steps = G // g_blk

    itemsize = q.dtype.itemsize
    blk_bytes = 2 * 3 * rows * d * itemsize + rows * rows * 4 + 2 * rows * d * itemsize
    kernel = functools.partial(_diag_block_attn_kernel, scale=scale,
                               tokens_per_block=T)
    out = pl.pallas_call(
        kernel,
        out_shape=jax.ShapeDtypeStruct((rows_total, d), q.dtype),
        grid=(steps,),
        in_specs=[
            pl.BlockSpec((rows, d), lambda i: (i, 0)),
            pl.BlockSpec((d, rows), lambda i: (0, i)),
            pl.BlockSpec((rows, d), lambda i: (i, 0)),
        ],
        out_specs=pl.BlockSpec((rows, d), lambda i: (i, 0)),
        compiler_params=pltpu.CompilerParams(
            dimension_semantics=("parallel",),
            vmem_limit_bytes=_vmem_limit(blk_bytes, info)),
    )(qf, kT, vf)
    return out.reshape(G, T, d)


# ----------------------------------------------------------------------------
# Static index tables: head-split + transform as ONE gather (and its inverse)
# ----------------------------------------------------------------------------
def _block_layout_indices(r, c, bs):
    """tok_idx[(ni*me+mi)*T + t] = source token index (or r*c sentinel = pad);
    inv_idx[src] = position of token src in the padded block layout."""
    n = r * c
    r_pad = (bs - r % bs) % bs
    c_pad = (bs - c % bs) % bs
    # NOTE: matches the PyTorch F.pad argument order exactly — the column axis
    # is padded by r_pad and the row axis by c_pad (benign when r == c).
    R, C = r + c_pad, c + r_pad
    assert R % bs == 0 and C % bs == 0, "padded grid must be block-divisible"
    ng, me = R // bs, C // bs
    T = bs * bs
    tok_idx = np.full((ng, me, T), n, dtype=np.int32)   # n = out-of-range sentinel
    inv_idx = np.zeros((n,), dtype=np.int32)
    for ni in range(ng):
        for mi in range(me):
            for g in range(bs):
                for e in range(bs):
                    row = ni * bs + g
                    col = mi * bs + e
                    t = g * bs + e
                    if row < r and col < c:
                        src = row * c + col
                        tok_idx[ni, mi, t] = src
                        inv_idx[src] = (ni * me + mi) * T + t
    return tok_idx.reshape(-1), inv_idx, ng, me


# ----------------------------------------------------------------------------
# Forward pass
# ----------------------------------------------------------------------------
def diag_block_attention(x, params, *, num_heads, dim_head, num_row_patches,
                         block_size):
    b, n, dim = x.shape
    h, d = num_heads, dim_head
    inner = h * d
    scale = d ** (-0.5)
    r = num_row_patches
    c = n // r

    # to_qkv (no bias) — Pallas matmul.
    qkv = pallas_linear(x.reshape(b * n, dim), params["w_qkv"])
    qkv = qkv.reshape(b, n, 3 * inner)

    # Single gather implements rearrange-to-heads + transform (pad + block
    # relayout) for q, k and v at once; padded edge positions gather zeros.
    tok_idx, inv_idx, ng, me = _block_layout_indices(r, c, block_size)
    T = block_size * block_size
    gathered = jnp.take(qkv, jnp.asarray(tok_idx), axis=1,
                        mode="fill", fill_value=0.0)              # (b, P, 3hd)
    gathered = gathered.reshape(b, ng * me, T, 3, h, d)

    q = jnp.transpose(gathered[:, :, :, 0], (0, 3, 1, 2, 4))      # (b,h,ngme,T,d)
    v = jnp.transpose(gathered[:, :, :, 2], (0, 3, 1, 2, 4))
    kT = jnp.transpose(gathered[:, :, :, 1], (4, 0, 3, 1, 2))     # (d,b,h,ngme,T)

    G = b * h * ng * me
    out = pallas_block_attention(q.reshape(G, T, d),
                                 kT.reshape(d, G * T),
                                 v.reshape(G, T, d), scale)       # (G, T, d)

    # reverse_transform + 'b h n d -> b n (h d)' as one transpose + one gather.
    out = out.reshape(b, h, ng * me * T, d)
    out = jnp.transpose(out, (0, 2, 1, 3)).reshape(b, ng * me * T, inner)
    out = jnp.take(out, jnp.asarray(inv_idx), axis=1)             # (b, n, inner)

    # to_out: Linear(inner, dim) with bias; dropout (eval) = identity.
    out = pallas_linear(out.reshape(b * n, inner), params["w_out"],
                        params["b_out"])
    return out.reshape(b, n, dim)


# ----------------------------------------------------------------------------
# Pure-JAX reference (faithful transform/reverse_transform reproduction)
# ----------------------------------------------------------------------------
def transform(x, r, c, bs):
    b, h, n, d = x.shape
    x = x.reshape(b, h, r, c, d)
    r_pad = (bs - r % bs) % bs
    c_pad = (bs - c % bs) % bs
    x = jnp.pad(x, ((0, 0), (0, 0), (0, c_pad), (0, r_pad), (0, 0)))
    R, C = r + c_pad, c + r_pad
    ng, me = R // bs, C // bs
    x = x.reshape(b, h, ng, bs, me, bs, d)
    x = jnp.transpose(x, (0, 1, 2, 4, 3, 5, 6))
    return x.reshape(b, h, ng, me, bs * bs, d)


def reverse_transform(x, r, c, bs):
    b, h, ng, me, T, d = x.shape
    x = x.reshape(b, h, ng, me, bs, bs, d)
    x = jnp.transpose(x, (0, 1, 2, 4, 3, 5, 6))
    x = x.reshape(b, h, ng * bs, me * bs, d)
    x = x[:, :, :r, :c, :]
    return x.reshape(b, h, r * c, d)


def diag_block_attention_ref(x, params, *, num_heads, dim_head, num_row_patches,
                             block_size):
    b, n, dim = x.shape
    inner = num_heads * dim_head
    scale = dim_head ** (-0.5)
    qkv = x @ params["w_qkv"]
    q, k, v = jnp.split(qkv, 3, axis=-1)
    to_heads = lambda t: jnp.transpose(
        t.reshape(b, n, num_heads, dim_head), (0, 2, 1, 3))
    q, k, v = map(to_heads, (q, k, v))
    r = num_row_patches
    c = n // r
    q = transform(q, r, c, block_size)
    k = transform(k, r, c, block_size)
    v = transform(v, r, c, block_size)
    dots = jnp.einsum("...nd,...md->...nm", q, k) * scale
    attn = jax.nn.softmax(dots, axis=-1)
    out = jnp.einsum("...ls,...sd->...ld", attn, v)
    out = reverse_transform(out, r, c, block_size)
    out = jnp.transpose(out, (0, 2, 1, 3)).reshape(b, n, inner)
    return out @ params["w_out"] + params["b_out"]


# ----------------------------------------------------------------------------
if __name__ == "__main__":
    # Small config consistent with the module's __init__.
    dim = 32
    num_heads = 2
    dim_head = 16
    num_row_patches = 7
    block_size = 4
    inner = num_heads * dim_head

    batch = 2
    seq = num_row_patches * num_row_patches  # 49 tokens (7x7 grid of patches)

    key = jax.random.PRNGKey(0)
    k1, k2, k3, kx, km1, km2, km3 = jax.random.split(key, 7)
    params = {
        "w_qkv": jax.random.normal(k1, (dim, 3 * inner), jnp.float32) * 0.02,
        "w_out": jax.random.normal(k2, (inner, dim), jnp.float32) * 0.02,
        "b_out": jax.random.normal(k3, (dim,), jnp.float32) * 0.02,
    }
    x = jax.random.normal(kx, (batch, seq, dim), jnp.float32)

    out = diag_block_attention(
        x, params,
        num_heads=num_heads, dim_head=dim_head,
        num_row_patches=num_row_patches, block_size=block_size,
    )
    out = jax.block_until_ready(out)

    ref = diag_block_attention_ref(
        x, params,
        num_heads=num_heads, dim_head=dim_head,
        num_row_patches=num_row_patches, block_size=block_size,
    )
    assert out.shape == (batch, seq, dim)
    assert jnp.allclose(out, ref, rtol=2e-3, atol=2e-3), "mismatch vs reference"

    # Also exercise the tiled + pad-to-tile pallas_linear path (ragged dims).
    xm = jax.random.normal(km1, (300, 520), jnp.float32)
    wm = jax.random.normal(km2, (520, 260), jnp.float32) * 0.05
    bm = jax.random.normal(km3, (260,), jnp.float32) * 0.05
    ym = jax.block_until_ready(pallas_linear(xm, wm, bm))
    assert jnp.allclose(ym, xm @ wm + bm, rtol=2e-3, atol=2e-3), \
        "tiled matmul mismatch"

    print("KERNEL_OK")
</pallas_src>

<mosaic_0001>
module attributes {stable_mosaic.version = 11 : i64} {
  func.func @_matmul_kernel(%arg0: memref<98x32xf32, #tpu.memory_space<vmem>>, %arg1: memref<32x96xf32, #tpu.memory_space<vmem>>, %arg2: memref<98x96xf32, #tpu.memory_space<vmem>>) attributes {dimension_semantics = [], scalar_prefetch = 0 : i64, scratch_operands = 0 : i64, tpu.core_type = #tpu.core_type<tc>} {
    %c0 = arith.constant 0 : index
    %c0_0 = arith.constant 0 : index
    %0 = vector.load %arg0[%c0, %c0_0] : memref<98x32xf32, #tpu.memory_space<vmem>>, vector<98x32xf32>
    %c0_1 = arith.constant 0 : index
    %c0_2 = arith.constant 0 : index
    %1 = vector.load %arg1[%c0_1, %c0_2] : memref<32x96xf32, #tpu.memory_space<vmem>>, vector<32x96xf32>
    %cst = arith.constant dense<0.000000e+00> : vector<98x96xf32>
    %2 = tpu.matmul %0, %1, %cst {dimension_numbers = #tpu.dot_dimension_numbers<[1], [0], [0], [1], [0, 0, 1, 1], [], []>} : vector<98x32xf32>, vector<32x96xf32>, vector<98x96xf32> -> vector<98x96xf32>
    %c0_3 = arith.constant 0 : index
    %c0_4 = arith.constant 0 : index
    %3 = vector.load %arg2[%c0_3, %c0_4] : memref<98x96xf32, #tpu.memory_space<vmem>>, vector<98x96xf32>
    tpu.vector_store %arg2[%c0_3, %c0_4], %2 {strides = array<i32>} : memref<98x96xf32, #tpu.memory_space<vmem>>, vector<98x96xf32>,
    return
  }
}

</mosaic_0001>

<bundles_post_ra>
// kernel: tpu_custom_call.1
= control target key start
LH: loop header
LB: loop body
LE: loop exit
PB: predicated region body
PF: predicated region fallthrough
CT: control target
= control target key end

     0   :  { %v304_v0 = vmov 0.0   ;;  %vm28_vm0 = vcmask 261120   ;;  %vm305_vm1 = vmmov 0   ;;  %vm198_vm2 = vcmask 785408   ;;  %s449_s1 = inlined_call_operand.vmem [shape: f32[32,96], index: 1, kind: input, shape index: {}]   ;;  %s450_s0 = inlined_call_operand.vmem [shape: f32[98,32], index: 0, kind: input, shape index: {}]   ;;  %s451_s2 = inlined_call_operand.vmem [shape: f32[98,96], index: 2, kind: output, shape index: {}]  }
   0x1   :  { %247 = vmatprep.subr.mxu0 %v304_v0  ;;  %v27_v1 = vld [vmem:[%s449_s1 + $0x18] sm:$0xff]  ;;  %294 = vmatprep.subr.mxu1 %v304_v0  ;;  %v26_v2 = vld [vmem:[%s449_s1 + $0x10] sm:$0xff]  ;;  %v25_v3 = vld [vmem:[%s449_s1 + $0x8] sm:$0xff]  ;;  %vm211_vm3 = vcmask 779264  }
   0x2   :  { %248 = vmatpush3.msra.mxu0 %v27_v1  ;;  %298 = vmatpush3.msra.mxu1 %v27_v1  ;;  %v24_v4 = vld [vmem:[%s449_s1] sm:$0xff]  ;;  %v18_v6 = vld [vmem:[%s450_s0 + $0x38] sm:$0xff]  ;;  %v12_v7 = vld [vmem:[%s450_s0 + $0x8] sm:$0xff] }
   0x3   :  { %249 = vmatprep.subr.mxu0 %v304_v0  ;;  %295 = vmatprep.subr.mxu1 %v304_v0  ;;  %v11_v5 = vld [vmem:[%s450_s0] sm:$0xff]  ;;  %v13_v9 = vld [vmem:[%s450_s0 + $0x10] sm:$0xff]  ;;  %v20_v10 = vld [vmem:[%s450_s0 + $0x48] sm:$0xff] }
   0x4   :  { %250 = vmatpush3.msra.mxu0 %v26_v2  ;;  %299 = vmatpush3.msra.mxu1 %v26_v2  ;;  %v19_v8 = vld [vmem:[%s450_s0 + $0x40] sm:$0xff]  ;;  %v14_v11 = vld [vmem:[%s450_s0 + $0x18] sm:$0xff]  ;;  %v21_v12 = vld [vmem:[%s450_s0 + $0x50] sm:$0xff] }
   0x5   :  { %251 = vmatprep.subr.mxu0 %v304_v0  ;;  %296 = vmatprep.subr.mxu1 %v304_v0  ;;  %v15_v13 = vld [vmem:[%s450_s0 + $0x20] sm:$0xff]  ;;  %v22_v14 = vld [vmem:[%s450_s0 + $0x58] sm:$0xff]  ;;  %v16_v15 = vld [vmem:[%s450_s0 + $0x28] sm:$0xff] }
   0x6   :  { %252 = vmatpush3.msra.mxu0 %v25_v3  ;;  %300 = vmatpush3.msra.mxu1 %v25_v3  ;;  %v23_v16 = vld [vmem:[%s450_s0 + $0x60] sm:$0x3]  ;;  %v17_v17 = vld [vmem:[%s450_s0 + $0x30] sm:$0xff] }
   0x7   :  { %253 = vmatprep.subr.mxu0 %v304_v0  ;;  %255 = vmatprep.mubr.msk.f32.mxu0 %vm305_vm1, %v304_v0 }
   0x8   :  { %254 = vmatpush3.msra.mxu0 %v24_v4  ;;  %297 = vmatprep.subr.mxu1 %v304_v0 }
   0x9   :  { %256 = vmatmul.mubr.msk.f32.vlgmr.msra.gmra.mxu0 %vm28_vm0, %v11_v5  ;;  %301 = vmatpush3.msra.mxu1 %v24_v4 }
   0xa   :  { %276 = vmatprep.mubr.msk.f32.mxu1 %vm305_vm1, %v304_v0  ;;  %258 = vmatprep.mubr.msk.f32.mxu0 %vm305_vm1, %v304_v0 }
   0xb   :  { %277 = vmatmul.mubr.msk.f32.vlgmr.msra.gmra.mxu1 %vm28_vm0, %v18_v6 }
   0xc   :  { %279 = vmatprep.mubr.msk.f32.mxu1 %vm305_vm1, %v304_v0 }
   0xd   :  { %259 = vmatmul.mubr.msk.f32.gmra.mxu0 %vm28_vm0, %v12_v7 }
   0xe   :  { %261 = vmatprep.mubr.msk.f32.mxu0 %vm305_vm1, %v304_v0 }
   0xf   :  { %280 = vmatmul.mubr.msk.f32.gmra.mxu1 %vm28_vm0, %v19_v8 }
  0x10   :  { %282 = vmatprep.mubr.msk.f32.mxu1 %vm305_vm1, %v304_v0 }
  0x11   :  { %262 = vmatmul.mubr.msk.f32.gmra.mxu0 %vm28_vm0, %v13_v9 }
  0x12   :  { %264 = vmatprep.mubr.msk.f32.mxu0 %vm305_vm1, %v304_v0 }
  0x13   :  { %283 = vmatmul.mubr.msk.f32.gmra.mxu1 %vm28_vm0, %v20_v10 }
  0x14   :  { %285 = vmatprep.mubr.msk.f32.mxu1 %vm305_vm1, %v304_v0 }
  0x15   :  { %265 = vmatmul.mubr.msk.f32.gmra.mxu0 %vm28_vm0, %v14_v11 }
  0x16   :  { %267 = vmatprep.mubr.msk.f32.mxu0 %vm305_vm1, %v304_v0 }
  0x17   :  { %286 = vmatmul.mubr.msk.f32.gmra.mxu1 %vm28_vm0, %v21_v12 }
  0x18   :  { %288 = vmatprep.mubr.msk.f32.mxu1 %vm305_vm1, %v304_v0 }
  0x19   :  { %268 = vmatmul.mubr.msk.f32.gmra.mxu0 %vm28_vm0, %v15_v13 }
  0x1a   :  { %270 = vmatprep.mubr.msk.f32.mxu0 %vm305_vm1, %v304_v0 }
  0x1b   :  { %289 = vmatmul.mubr.msk.f32.gmra.mxu1 %vm28_vm0, %v22_v14 }
  0x1c   :  { %291 = vmatprep.mubr.msk.f32.mxu1 %vm305_vm1, %v304_v0 }
  0x1d   :  { %271 = vmatmul.mubr.msk.f32.gmra.mxu0 %vm28_vm0, %v16_v15 }
  0x1e   :  { %273 = vmatprep.mubr.msk.f32.mxu0 %vm305_vm1, %v304_v0 }
  0x1f   :  { %292 = vmatmul.mubr.msk.f32.gmra.mxu1 %vm28_vm0, %v23_v16 }
  0x21   :  { %274 = vmatmul.mubr.msk.f32.gmra.mxu0 %vm28_vm0, %v17_v17 }
  0xc9   :  { %v134_v18 = vpop.f32.mrf.mxu0 }
  0xca   :  { %199 = vst.msk [vmem:[%s451_s2] sm:$0xff] %vm198_vm2, %v134_v18 }
  0xcb   :  { %v257_v19 = vpop.f32.mrf.mxu0  ;;  %v169_v20 = vpop.f32.mrf.mxu1 }
  0xcc   :  { %206 = vst.msk [vmem:[%s451_s2 + $0x38] sm:$0xff] %vm198_vm2, %v169_v20 }
  0xcd   :  { %v139_v21 = vpop.f32.mrf.mxu0  ;;  %v278_v22 = vpop.f32.mrf.mxu1 }
  0xce   :  { %200 = vst.msk [vmem:[%s451_s2 + $0x8] sm:$0xff] %vm198_vm2, %v139_v21 }
  0xcf   :  { %v260_v23 = vpop.f32.mrf.mxu0  ;;  %v174_v24 = vpop.f32.mrf.mxu1 }
  0xd0   :  { %207 = vst.msk [vmem:[%s451_s2 + $0x40] sm:$0xff] %vm198_vm2, %v174_v24 }
  0xd1   :  { %v144_v25 = vpop.f32.mrf.mxu0  ;;  %v281_v26 = vpop.f32.mrf.mxu1 }
  0xd2   :  { %201 = vst.msk [vmem:[%s451_s2 + $0x10] sm:$0xff] %vm198_vm2, %v144_v25 }
  0xd3   :  { %v263_v27 = vpop.f32.mrf.mxu0  ;;  %v179_v28 = vpop.f32.mrf.mxu1 }
  0xd4   :  { %208 = vst.msk [vmem:[%s451_s2 + $0x48] sm:$0xff] %vm198_vm2, %v179_v28 }
  0xd5   :  { %v149_v29 = vpop.f32.mrf.mxu0  ;;  %v284_v30 = vpop.f32.mrf.mxu1 }
  0xd6   :  { %202 = vst.msk [vmem:[%s451_s2 + $0x18] sm:$0xff] %vm198_vm2, %v149_v29 }
  0xd7   :  { %v266_v31 = vpop.f32.mrf.mxu0  ;;  %v184_v32 = vpop.f32.mrf.mxu1 }
  0xd8   :  { %209 = vst.msk [vmem:[%s451_s2 + $0x50] sm:$0xff] %vm198_vm2, %v184_v32 }
  0xd9   :  { %v154_v33 = vpop.f32.mrf.mxu0  ;;  %v287_v34 = vpop.f32.mrf.mxu1 }
  0xda   :  { %203 = vst.msk [vmem:[%s451_s2 + $0x20] sm:$0xff] %vm198_vm2, %v154_v33 }
  0xdb   :  { %v269_v35 = vpop.f32.mrf.mxu0  ;;  %v189_v36 = vpop.f32.mrf.mxu1 }
  0xdc   :  { %210 = vst.msk [vmem:[%s451_s2 + $0x58] sm:$0xff] %vm198_vm2, %v189_v36 }
  0xdd   :  { %v159_v37 = vpop.f32.mrf.mxu0  ;;  %v290_v38 = vpop.f32.mrf.mxu1 }
  0xde   :  { %204 = vst.msk [vmem:[%s451_s2 + $0x28] sm:$0xff] %vm198_vm2, %v159_v37 }
  0xdf   :  { %v272_v39 = vpop.f32.mrf.mxu0  ;;  %v194_v40 = vpop.f32.mrf.mxu1 }
  0xe0   :  { %212 = vst.msk [vmem:[%s451_s2 + $0x60] sm:$0x3] %vm211_vm3, %v194_v40 }
  0xe1   :  { %v164_v41 = vpop.f32.mrf.mxu0  ;;  %v293_v42 = vpop.f32.mrf.mxu1 }
  0xe2   :  { %205 = vst.msk [vmem:[%s451_s2 + $0x30] sm:$0xff] %vm198_vm2, %v164_v41 }
  0xe3   :  { %v275_v43 = vpop.f32.mrf.mxu0 }

</bundles_post_ra>
